<compile_context>
chip_gen: v7x
topology: tpu7x:2x2x1
jax: 0.10.0
libtpu: 0.0.40
codegen_flags: <defaults>
</compile_context>

<pallas_src>
import functools

import jax
import jax.numpy as jnp
from jax import lax
from jax.experimental import pallas as pl
from jax.experimental.pallas import tpu as pltpu

_HEADS = 8


def _vmem_limit_bytes():
    try:
        info = pltpu.get_tpu_info()
        cap = getattr(info, "vmem_capacity_bytes", None)
        if cap:
            return min(int(cap) * 3 // 4, 100 * 1024 * 1024)
    except Exception:
        pass
    return 48 * 1024 * 1024


_VMEM_LIMIT = _vmem_limit_bytes()


def _pick_tile(dim, prefs):
    """Largest preferred tile that divides `dim`, else the full dim (always legal)."""
    for p in prefs:
        if dim % p == 0:
            return p
    return dim


# --------------------------------------------------------------------------
# Pallas kernels
# --------------------------------------------------------------------------

def _mm_kernel(x_ref, w_ref, b_ref, *rest, act, pre_silu, has_extra):
    """Tiled matmul: out = act((pre_silu?silu(x):x) @ w + b) [+ extra]."""
    if has_extra:
        e_ref, o_ref, acc_ref = rest
    else:
        o_ref, acc_ref = rest
        e_ref = None
    k = pl.program_id(2)

    @pl.when(k == 0)
    def _():
        acc_ref[...] = jnp.zeros_like(acc_ref)

    x = x_ref[...]
    if pre_silu:
        # NOTE: re-evaluated per N-tile; only used for the tiny time-embedding matmul.
        xf = x.astype(jnp.float32)
        x = xf * jax.nn.sigmoid(xf)
    acc_ref[...] += jnp.dot(x.astype(jnp.bfloat16), w_ref[...],
                            preferred_element_type=jnp.float32)

    @pl.when(k == pl.num_programs(2) - 1)
    def _():
        acc = acc_ref[...] + b_ref[...]
        if act == "silu":
            acc = acc * jax.nn.sigmoid(acc)
        if has_extra:
            acc = acc + e_ref[...].astype(jnp.float32)
        o_ref[...] = acc.astype(o_ref.dtype)


def _mm_geglu_kernel(x_ref, wa_ref, wg_ref, ba_ref, bg_ref, o_ref, acc_a, acc_g):
    """Fused fc0 + GEGLU: out = (x@Wa + ba) * gelu(x@Wg + bg)   (exact erf GELU)."""
    k = pl.program_id(2)

    @pl.when(k == 0)
    def _():
        acc_a[...] = jnp.zeros_like(acc_a)
        acc_g[...] = jnp.zeros_like(acc_g)

    x = x_ref[...].astype(jnp.bfloat16)
    acc_a[...] += jnp.dot(x, wa_ref[...], preferred_element_type=jnp.float32)
    acc_g[...] += jnp.dot(x, wg_ref[...], preferred_element_type=jnp.float32)

    @pl.when(k == pl.num_programs(2) - 1)
    def _():
        a = acc_a[...] + ba_ref[...]
        g = acc_g[...] + bg_ref[...]
        g = 0.5 * g * (1.0 + lax.erf(g * (2.0 ** -0.5)))
        o_ref[...] = (a * g).astype(o_ref.dtype)


def _gn_stats_kernel(x_ref, red_ref, stat_ref):
    """Accumulate per-group [sum, sumsq] over HW tiles.  x block (1, t_hw, C)."""
    @pl.when(pl.program_id(1) == 0)
    def _():
        stat_ref[...] = jnp.zeros_like(stat_ref)

    x = x_ref[0].astype(jnp.float32)                      # (t_hw, C)
    s = jnp.sum(x, axis=0, keepdims=True)                 # (1, C)
    ss = jnp.sum(x * x, axis=0, keepdims=True)
    both = jnp.concatenate([s, ss], axis=0)               # (2, C)
    # (2, C) @ (C, G) group-reduce on the MXU.
    stat_ref[0] += jnp.dot(both, red_ref[...], preferred_element_type=jnp.float32)


def _gn_norm_kernel(x_ref, stat_ref, g_ref, b_ref, bc_ref, o_ref, *, eps, n, act):
    """Normalize one HW tile of one image with precomputed group stats."""
    x = x_ref[0].astype(jnp.float32)                      # (t_hw, C)
    st = stat_ref[0]                                      # (2, G)
    mean_g = st[0:1, :] / n                               # (1, G)
    # Variance via E[x^2]-E[x]^2 in f32 (stats accumulated in f32).
    var_g = st[1:2, :] / n - mean_g * mean_g
    inv_g = lax.rsqrt(var_g + eps)
    mean = jnp.dot(mean_g, bc_ref[...], preferred_element_type=jnp.float32)   # (1, C)
    inv = jnp.dot(inv_g, bc_ref[...], preferred_element_type=jnp.float32)
    y = (x - mean) * inv * g_ref[...] + b_ref[...]
    if act == "silu":
        y = y * jax.nn.sigmoid(y)
    o_ref[0] = y.astype(o_ref.dtype)


def _ln_kernel(x_ref, g_ref, b_ref, o_ref, *, eps):
    """LayerNorm over the last dim; x block is (tm, C)."""
    x = x_ref[...].astype(jnp.float32)
    mean = jnp.mean(x, axis=-1, keepdims=True)
    xc = x - mean
    var = jnp.mean(xc * xc, axis=-1, keepdims=True)
    o_ref[...] = (xc * lax.rsqrt(var + eps) * g_ref[...] + b_ref[...]).astype(o_ref.dtype)


def _mha_flash_kernel(q_ref, k_ref, v_ref, o_ref, m_sc, l_sc, acc_sc, *, heads, d):
    """All-heads flash attention on full-width (tq, heads*d) blocks.

    Online softmax per head over the Lk axis.  Softmax scale is pre-folded into Wq."""
    kv = pl.program_id(2)

    @pl.when(kv == 0)
    def _():
        m_sc[...] = jnp.full_like(m_sc, -jnp.inf)
        l_sc[...] = jnp.zeros_like(l_sc)
        acc_sc[...] = jnp.zeros_like(acc_sc)

    q = q_ref[0].astype(jnp.bfloat16)                     # (tq, D)
    k = k_ref[0].astype(jnp.bfloat16)                     # (tk, D)
    v = v_ref[0].astype(jnp.bfloat16)
    m_prev = m_sc[...]                                    # (tq, heads)
    l_prev = l_sc[...]
    acc_prev = acc_sc[...]                                # (tq, D)

    m_cols, l_cols, acc_cols = [], [], []
    for h in range(heads):
        sl = slice(h * d, (h + 1) * d)
        s = lax.dot_general(q[:, sl], k[:, sl], (((1,), (1,)), ((), ())),
                            preferred_element_type=jnp.float32)        # (tq, tk)
        m_p = m_prev[:, h:h + 1]
        m_n = jnp.maximum(m_p, jnp.max(s, axis=-1, keepdims=True))
        alpha = jnp.exp(m_p - m_n)
        p = jnp.exp(s - m_n)
        l_n = alpha * l_prev[:, h:h + 1] + jnp.sum(p, axis=-1, keepdims=True)
        a_n = alpha * acc_prev[:, sl] + jnp.dot(p.astype(jnp.bfloat16), v[:, sl],
                                                preferred_element_type=jnp.float32)
        m_cols.append(m_n)
        l_cols.append(l_n)
        acc_cols.append(a_n)

    m_sc[...] = jnp.concatenate(m_cols, axis=-1)
    l_sc[...] = jnp.concatenate(l_cols, axis=-1)
    acc_sc[...] = jnp.concatenate(acc_cols, axis=-1)

    @pl.when(kv == pl.num_programs(2) - 1)
    def _():
        inv = pl.reciprocal(l_sc[...], approx=True)                     # (tq, heads)
        acc = acc_sc[...]
        outs = [acc[:, h * d:(h + 1) * d] * inv[:, h:h + 1] for h in range(heads)]
        o_ref[0] = jnp.concatenate(outs, axis=-1).astype(o_ref.dtype)


def _conv3x3_kernel(*refs, TR, Wo, Cout, stride, has_cadd, has_radd):
    """3x3 conv, one band of TR output rows per grid step.

    stride=1: a single padded image ref (resident in VMEM across bands); the 9 taps are
    accumulated with unit-stride row/column slices and (TR*Wo, Cin)@(Cin, Cout) dots.
    stride=2: four row/col parity views of the padded image (prepared in JAX) so the
    kernel only computes the kept output rows and columns, still with unit-stride
    slices.  Bias, per-batch channel add (time) and residual add are fused."""
    n_x = 1 if stride == 1 else 4
    x_refs = refs[:n_x]
    w_ref = refs[n_x]
    b_ref = refs[n_x + 1]
    idx = n_x + 2
    cadd_ref = refs[idx] if has_cadd else None
    idx += 1 if has_cadd else 0
    radd_ref = refs[idx] if has_radd else None
    idx += 1 if has_radd else 0
    o_ref = refs[idx]

    row0 = pl.multiple_of(pl.program_id(1) * TR, TR)

    slab_cache = {}

    def get_slab(src_idx, ro):
        key = (src_idx, ro)
        if key not in slab_cache:
            slab_cache[key] = x_refs[src_idx][0, pl.ds(row0 + ro, TR), :, :]
        return slab_cache[key]

    acc = jnp.zeros((TR * Wo, Cout), jnp.float32)
    for dy in range(3):
        for dx in range(3):
            if stride == 1:
                src_idx, ro, co = 0, dy, dx
            else:
                src_idx = (dy % 2) * 2 + (dx % 2)
                ro, co = dy // 2, dx // 2
            slab = get_slab(src_idx, ro)                        # (TR, Wsrc, Cin)
            cols = lax.slice_in_dim(slab, co, co + Wo, axis=1)  # (TR, Wo, Cin)
            x2 = cols.reshape(TR * Wo, -1).astype(jnp.bfloat16)
            acc = acc + jnp.dot(x2, w_ref[3 * dy + dx],
                                preferred_element_type=jnp.float32)

    acc = acc + b_ref[...]
    if has_cadd:
        acc = acc + cadd_ref[...].astype(jnp.float32)           # (1, Cout) broadcast
    out = acc.reshape(TR, Wo, Cout)
    if has_radd:
        out = out + radd_ref[0].astype(jnp.float32)             # (TR, Wo, Cout)
    o_ref[0] = out.astype(o_ref.dtype)


# --------------------------------------------------------------------------
# Pallas wrappers
# --------------------------------------------------------------------------

def pallas_matmul(x, wT, b2, act="none", pre_silu=False, extra=None,
                  out_dtype=jnp.bfloat16):
    """x: (M,K) bf16/f32, wT: (K,N) bf16, b2: (1,N) f32, extra: (M,N) bf16."""
    M, K = x.shape
    N = wT.shape[1]

    tm = _pick_tile(M, (512, 256, 128, 64, 32, 16, 8))
    tn = _pick_tile(N, (512, 256, 128))
    tk = _pick_tile(K, (1024, 512, 256, 128))
    grid = (M // tm, N // tn, K // tk)

    in_specs = [pl.BlockSpec((tm, tk), lambda i, j, k: (i, k)),
                pl.BlockSpec((tk, tn), lambda i, j, k: (k, j)),
                pl.BlockSpec((1, tn), lambda i, j, k: (0, j))]
    args = [x, wT, b2]
    if extra is not None:
        in_specs.append(pl.BlockSpec((tm, tn), lambda i, j, k: (i, j)))
        args.append(extra)

    kernel = functools.partial(_mm_kernel, act=act, pre_silu=pre_silu,
                               has_extra=extra is not None)
    return pl.pallas_call(
        kernel,
        out_shape=jax.ShapeDtypeStruct((M, N), out_dtype),
        grid=grid,
        in_specs=in_specs,
        out_specs=pl.BlockSpec((tm, tn), lambda i, j, k: (i, j)),
        scratch_shapes=[pltpu.VMEM((tm, tn), jnp.float32)],
        compiler_params=pltpu.CompilerParams(
            dimension_semantics=("parallel", "parallel", "arbitrary"),
            vmem_limit_bytes=_VMEM_LIMIT),
    )(*args)


def pallas_fc0_geglu(x, p):
    """Fused fc0 matmul + GEGLU gate.  p = (waT, wgT, ba, bg) pre-transposed bf16."""
    waT, wgT, ba, bg = p
    shp = x.shape
    K, N = waT.shape
    x2 = x.reshape(-1, K)
    M = x2.shape[0]

    tm = _pick_tile(M, (512, 256, 128, 64, 32, 16, 8))
    tn = _pick_tile(N, (512, 256, 128))
    tk = _pick_tile(K, (1024, 512, 256, 128))
    out = pl.pallas_call(
        _mm_geglu_kernel,
        out_shape=jax.ShapeDtypeStruct((M, N), jnp.bfloat16),
        grid=(M // tm, N // tn, K // tk),
        in_specs=[pl.BlockSpec((tm, tk), lambda i, j, k: (i, k)),
                  pl.BlockSpec((tk, tn), lambda i, j, k: (k, j)),
                  pl.BlockSpec((tk, tn), lambda i, j, k: (k, j)),
                  pl.BlockSpec((1, tn), lambda i, j, k: (0, j)),
                  pl.BlockSpec((1, tn), lambda i, j, k: (0, j))],
        out_specs=pl.BlockSpec((tm, tn), lambda i, j, k: (i, j)),
        scratch_shapes=[pltpu.VMEM((tm, tn), jnp.float32),
                        pltpu.VMEM((tm, tn), jnp.float32)],
        compiler_params=pltpu.CompilerParams(
            dimension_semantics=("parallel", "parallel", "arbitrary"),
            vmem_limit_bytes=_VMEM_LIMIT),
    )(x2, waT, wgT, ba, bg)
    return out.reshape(shp[:-1] + (N,))


def pallas_groupnorm(x_nhwc, gn, act="none"):
    """Two-pass, HW-tiled GroupNorm (+optional SiLU).  Returns bf16 NHWC."""
    B, H, W, C = x_nhwc.shape
    HW = H * W
    G = gn["G"]
    x3 = x_nhwc.reshape(B, HW, C)
    t_hw = _pick_tile(HW, (1024, 512, 256, 128, 64, 32, 16, 8))
    n_t = HW // t_hw

    stats = pl.pallas_call(
        _gn_stats_kernel,
        out_shape=jax.ShapeDtypeStruct((B, 2, G), jnp.float32),
        grid=(B, n_t),
        in_specs=[pl.BlockSpec((1, t_hw, C), lambda b, t: (b, t, 0)),
                  pl.BlockSpec((C, G), lambda b, t: (0, 0))],
        out_specs=pl.BlockSpec((1, 2, G), lambda b, t: (b, 0, 0)),
        compiler_params=pltpu.CompilerParams(
            dimension_semantics=("parallel", "arbitrary"),
            vmem_limit_bytes=_VMEM_LIMIT),
    )(x3, gn["red"])

    n = float(HW * (C // G))
    out = pl.pallas_call(
        functools.partial(_gn_norm_kernel, eps=gn["eps"], n=n, act=act),
        out_shape=jax.ShapeDtypeStruct((B, HW, C), jnp.bfloat16),
        grid=(B, n_t),
        in_specs=[pl.BlockSpec((1, t_hw, C), lambda b, t: (b, t, 0)),
                  pl.BlockSpec((1, 2, G), lambda b, t: (b, 0, 0)),
                  pl.BlockSpec((1, C), lambda b, t: (0, 0)),
                  pl.BlockSpec((1, C), lambda b, t: (0, 0)),
                  pl.BlockSpec((G, C), lambda b, t: (0, 0))],
        out_specs=pl.BlockSpec((1, t_hw, C), lambda b, t: (b, t, 0)),
        compiler_params=pltpu.CompilerParams(
            dimension_semantics=("parallel", "parallel"),
            vmem_limit_bytes=_VMEM_LIMIT),
    )(x3, stats, gn["gamma"], gn["beta"], gn["bcast"])
    return out.reshape(B, H, W, C)


def pallas_layernorm(x, p, eps=1e-5):
    gamma, beta = p
    shp = x.shape
    C = shp[-1]
    x2 = x.reshape(-1, C)
    M = x2.shape[0]
    tm = _pick_tile(M, (512, 256, 128, 64, 32, 16, 8))
    out = pl.pallas_call(
        functools.partial(_ln_kernel, eps=eps),
        out_shape=jax.ShapeDtypeStruct((M, C), jnp.bfloat16),
        grid=(M // tm,),
        in_specs=[pl.BlockSpec((tm, C), lambda i: (i, 0)),
                  pl.BlockSpec((1, C), lambda i: (0, 0)),
                  pl.BlockSpec((1, C), lambda i: (0, 0))],
        out_specs=pl.BlockSpec((tm, C), lambda i: (i, 0)),
        compiler_params=pltpu.CompilerParams(
            dimension_semantics=("parallel",), vmem_limit_bytes=_VMEM_LIMIT),
    )(x2, gamma, beta)
    return out.reshape(shp)


def pallas_attention(q, k, v, heads=_HEADS):
    """Multi-head flash attention on merged-head layout.  q: (B, Lq, D), k/v: (B, Lk, D)."""
    B, Lq, D = q.shape
    _, Lk, _ = k.shape
    d = D // heads
    tq = _pick_tile(Lq, (512, 256, 128))
    tk = _pick_tile(Lk, (512, 256, 128))
    # TODO(synk): ragged encoder lengths (e.g. CLIP's 77) fall back to a single Lk tile;
    # add explicit padding+masking if tiling of non-divisible Lk is needed.
    kernel = functools.partial(_mha_flash_kernel, heads=heads, d=d)
    return pl.pallas_call(
        kernel,
        out_shape=jax.ShapeDtypeStruct((B, Lq, D), jnp.bfloat16),
        grid=(B, Lq // tq, Lk // tk),
        in_specs=[pl.BlockSpec((1, tq, D), lambda b, i, j: (b, i, 0)),
                  pl.BlockSpec((1, tk, D), lambda b, i, j: (b, j, 0)),
                  pl.BlockSpec((1, tk, D), lambda b, i, j: (b, j, 0))],
        out_specs=pl.BlockSpec((1, tq, D), lambda b, i, j: (b, i, 0)),
        scratch_shapes=[pltpu.VMEM((tq, heads), jnp.float32),
                        pltpu.VMEM((tq, heads), jnp.float32),
                        pltpu.VMEM((tq, D), jnp.float32)],
        compiler_params=pltpu.CompilerParams(
            dimension_semantics=("parallel", "parallel", "arbitrary"),
            vmem_limit_bytes=_VMEM_LIMIT),
    )(q, k, v)


def pallas_conv3x3(x_nhwc, conv_p, stride=1, cadd=None, radd=None):
    """3x3 conv, padding=1, banded per-output-row-tile kernel.

    stride=1: padded image resident in VMEM, TR output rows per grid step.
    stride=2: row/col parity decomposition (plain JAX, once) -> only kept outputs computed.
    cadd: (B, Cout) per-batch channel add (time embedding); radd: (B, H, W, Cout) residual."""
    w9, b2 = conv_p
    B, H, W, Cin = x_nhwc.shape
    Cout = w9.shape[-1]
    xp = jnp.pad(x_nhwc, ((0, 0), (1, 1), (1, 1), (0, 0)))
    if stride == 1:
        Ho, Wo = H, W
        xs = [xp]
    else:
        Ho, Wo = H // 2, W // 2
        xs = [xp[:, 0::2, 0::2, :], xp[:, 0::2, 1::2, :],
              xp[:, 1::2, 0::2, :], xp[:, 1::2, 1::2, :]]

    TR = _pick_tile(Ho, (16, 8, 4, 2))
    grid = (B, Ho // TR)

    in_specs = [pl.BlockSpec((1,) + a.shape[1:], lambda bb, r: (bb, 0, 0, 0)) for a in xs]
    in_specs += [pl.BlockSpec(w9.shape, lambda bb, r: (0, 0, 0)),
                 pl.BlockSpec((1, Cout), lambda bb, r: (0, 0))]
    args = xs + [w9, b2]
    if cadd is not None:
        in_specs.append(pl.BlockSpec((1, Cout), lambda bb, r: (bb, 0)))
        args.append(cadd)
    if radd is not None:
        assert stride == 1
        in_specs.append(pl.BlockSpec((1, TR, Wo, Cout), lambda bb, r: (bb, r, 0, 0)))
        args.append(radd)

    kernel = functools.partial(_conv3x3_kernel, TR=TR, Wo=Wo, Cout=Cout, stride=stride,
                               has_cadd=cadd is not None, has_radd=radd is not None)
    return pl.pallas_call(
        kernel,
        out_shape=jax.ShapeDtypeStruct((B, Ho, Wo, Cout), jnp.bfloat16),
        grid=grid,
        in_specs=in_specs,
        out_specs=pl.BlockSpec((1, TR, Wo, Cout), lambda bb, r: (bb, r, 0, 0)),
        compiler_params=pltpu.CompilerParams(
            dimension_semantics=("parallel", "parallel"),
            vmem_limit_bytes=_VMEM_LIMIT),
    )(*args)


# --------------------------------------------------------------------------
# Layer glue (plain JAX plumbing around the kernels)
# --------------------------------------------------------------------------

def linear(x, p, act="none", pre_silu=False, extra=None):
    """p = (wT (K,N) bf16, b (1,N) f32) -- prepared layout."""
    wT, b2 = p
    K, N = wT.shape
    shp = x.shape
    x2 = x.reshape(-1, K)
    e = extra.reshape(-1, N) if extra is not None else None
    out = pallas_matmul(x2, wT, b2, act=act, pre_silu=pre_silu, extra=e)
    return out.reshape(shp[:-1] + (N,))


def conv1x1(x_nhwc, p, extra=None):
    B, H, W, Cin = x_nhwc.shape
    wT, b2 = p
    Cout = wT.shape[1]
    e = extra.reshape(-1, Cout) if extra is not None else None
    out = pallas_matmul(x_nhwc.reshape(-1, Cin), wT, b2, extra=e)
    return out.reshape(B, H, W, Cout)


def resnet_forward(p, x, time_emb):
    """x: NHWC bf16; time_emb: (B, 1280)."""
    t = linear(time_emb, p["time_lin"], pre_silu=True)                    # SiLU -> Linear
    h = pallas_groupnorm(x, p["gn0"], act="silu")
    h = pallas_conv3x3(h, p["conv0"], stride=1, cadd=t)                   # + time (C,1,1)
    h = pallas_groupnorm(h, p["gn1"], act="silu")
    res = conv1x1(x, p["res_conv"]) if p["res_conv"] is not None else x
    return pallas_conv3x3(h, p["conv1"], stride=1, radd=res)              # + residual


def cross_attention_forward(p, q, kv, residual):
    qp = linear(q, p["wq"])          # softmax scale folded into Wq at prep time
    kp = linear(kv, p["wk"])
    vp = linear(kv, p["wv"])
    o = pallas_attention(qp, kp, vp, heads=_HEADS)
    return linear(o, p["out"], extra=residual)                            # fused "+ q"


def transformer_forward(p, q_nhwc, kv):
    B, H, W, dim = q_nhwc.shape
    res1 = q_nhwc
    h = pallas_groupnorm(q_nhwc, p["norm_in"])                            # eps=1e-6
    h = conv1x1(h, p["cnn_in"])
    h = h.reshape(B, H * W, dim)

    n0 = pallas_layernorm(h, p["norm_atten0"], eps=1e-5)
    h = cross_attention_forward(p["atten1"], n0, n0, residual=h)
    n1 = pallas_layernorm(h, p["norm_atten1"], eps=1e-5)
    h = cross_attention_forward(p["atten2"], n1, kv, residual=h)

    res2 = h
    g = pallas_layernorm(h, p["norm_act"], eps=1e-5)
    g = pallas_fc0_geglu(g, p["fc0"])                                     # fc0 + GEGLU fused
    g = linear(g, p["fc1"], extra=res2)                                   # fused "+ res2"
    g = g.reshape(B, H, W, dim)
    return conv1x1(g, p["cnn_out"], extra=res1)                           # fused "+ res1"


def downblock_forward(params, out_vae_nchw, out_encoder, time):
    x = jnp.transpose(out_vae_nchw, (0, 2, 3, 1)).astype(jnp.bfloat16)    # NCHW -> NHWC bf16
    kv = out_encoder.astype(jnp.bfloat16)

    x = resnet_forward(params["res0"], x, time)
    x = transformer_forward(params["tf0"], x, kv)
    out0 = x
    x = resnet_forward(params["res1"], x, time)
    x = transformer_forward(params["tf1"], x, kv)
    out1 = x
    x_down = pallas_conv3x3(x, params["out"], stride=2)

    to_nchw = lambda a: jnp.transpose(a, (0, 3, 1, 2)).astype(jnp.float32)
    return to_nchw(x_down), (to_nchw(out0), to_nchw(out1), to_nchw(x_down))


# --------------------------------------------------------------------------
# Parameter preparation: transpose / cast / reshape weights exactly once
# --------------------------------------------------------------------------

def _prep_linear(p):
    w, b = p
    out_f = w.shape[0]
    wT = jnp.transpose(w).astype(jnp.bfloat16)
    bb = b if b is not None else jnp.zeros((out_f,), jnp.float32)
    return (wT, bb.reshape(1, out_f).astype(jnp.float32))


def _prep_conv1x1(p):
    w, b = p
    cout, cin = w.shape[:2]
    return (jnp.transpose(w.reshape(cout, cin)).astype(jnp.bfloat16),
            b.reshape(1, cout).astype(jnp.float32))


def _prep_conv3x3(p):
    w, b = p
    cout, cin = w.shape[:2]
    w9 = jnp.transpose(w, (2, 3, 1, 0)).reshape(9, cin, cout).astype(jnp.bfloat16)
    return (w9, b.reshape(1, cout).astype(jnp.float32))


def _prep_norm(p):
    gamma, beta = p
    return (gamma.reshape(1, -1).astype(jnp.float32),
            beta.reshape(1, -1).astype(jnp.float32))


def _prep_groupnorm(p, eps, num_groups=32):
    gamma, beta = p
    C = gamma.shape[0]
    G = num_groups
    gidx = jnp.arange(C) // (C // G)
    red = (gidx[:, None] == jnp.arange(G)[None, :]).astype(jnp.float32)   # (C, G)
    return {"gamma": gamma.reshape(1, C).astype(jnp.float32),
            "beta": beta.reshape(1, C).astype(jnp.float32),
            "red": red, "bcast": red.T, "G": G, "eps": eps}


def _prep_geglu(p):
    w, b = p
    half = w.shape[0] // 2
    return (jnp.transpose(w[:half]).astype(jnp.bfloat16),
            jnp.transpose(w[half:]).astype(jnp.bfloat16),
            b[:half].reshape(1, half).astype(jnp.float32),
            b[half:].reshape(1, half).astype(jnp.float32))


def prepare_cross_attention(p, dim_q):
    scale = float(dim_q // _HEADS) ** -0.5
    wq, _ = p["wq"]
    wq_t = (jnp.transpose(wq) * scale).astype(jnp.bfloat16)   # exact: q proj has no bias
    zb = jnp.zeros((1, dim_q), jnp.float32)
    return {"wq": (wq_t, zb),
            "wk": _prep_linear(p["wk"]),
            "wv": _prep_linear(p["wv"]),
            "out": _prep_linear(p["out"])}


def prepare_resnet(p):
    return {"time_lin": _prep_linear(p["time_lin"]),
            "gn0": _prep_groupnorm(p["gn0"], eps=1e-5),
            "conv0": _prep_conv3x3(p["conv0"]),
            "gn1": _prep_groupnorm(p["gn1"], eps=1e-5),
            "conv1": _prep_conv3x3(p["conv1"]),
            "res_conv": _prep_conv1x1(p["res_conv"]) if p["res_conv"] is not None else None}


def prepare_transformer(p, dim):
    return {"norm_in": _prep_groupnorm(p["norm_in"], eps=1e-6),
            "cnn_in": _prep_conv1x1(p["cnn_in"]),
            "norm_atten0": _prep_norm(p["norm_atten0"]),
            "atten1": prepare_cross_attention(p["atten1"], dim),
            "norm_atten1": _prep_norm(p["norm_atten1"]),
            "atten2": prepare_cross_attention(p["atten2"], dim),
            "norm_act": _prep_norm(p["norm_act"]),
            "fc0": _prep_geglu(p["fc0"]),
            "fc1": _prep_linear(p["fc1"]),
            "cnn_out": _prep_conv1x1(p["cnn_out"])}


def prepare_downblock(p, dim_out):
    return {"res0": prepare_resnet(p["res0"]),
            "tf0": prepare_transformer(p["tf0"], dim_out),
            "res1": prepare_resnet(p["res1"]),
            "tf1": prepare_transformer(p["tf1"], dim_out),
            "out": _prep_conv3x3(p["out"])}


# --------------------------------------------------------------------------
# Deterministic parameter initialization (synthetic; torch layouts per __init__)
# --------------------------------------------------------------------------

def _init_linear(key, out_f, in_f, bias=True):
    k1, k2 = jax.random.split(key)
    w = 0.02 * jax.random.normal(k1, (out_f, in_f), jnp.float32)
    b = 0.02 * jax.random.normal(k2, (out_f,), jnp.float32) if bias else None
    return (w, b)


def _init_conv(key, cout, cin, k):
    k1, k2 = jax.random.split(key)
    w = 0.02 * jax.random.normal(k1, (cout, cin, k, k), jnp.float32)
    b = 0.02 * jax.random.normal(k2, (cout,), jnp.float32)
    return (w, b)


def _init_norm(key, c):
    k1, k2 = jax.random.split(key)
    gamma = 1.0 + 0.1 * jax.random.normal(k1, (c,), jnp.float32)
    beta = 0.1 * jax.random.normal(k2, (c,), jnp.float32)
    return (gamma, beta)


def init_cross_attention(key, dim_q, dim_kv):
    ks = jax.random.split(key, 4)
    return {"wq": _init_linear(ks[0], dim_q, dim_q, bias=False),
            "wk": _init_linear(ks[1], dim_q, dim_kv, bias=False),
            "wv": _init_linear(ks[2], dim_q, dim_kv, bias=False),
            "out": _init_linear(ks[3], dim_q, dim_q, bias=True)}


def init_resnet(key, dim_in, dim_out):
    ks = jax.random.split(key, 6)
    return {"time_lin": _init_linear(ks[0], dim_out, 1280),
            "gn0": _init_norm(ks[1], dim_in),
            "conv0": _init_conv(ks[2], dim_out, dim_in, 3),
            "gn1": _init_norm(ks[3], dim_out),
            "conv1": _init_conv(ks[4], dim_out, dim_out, 3),
            "res_conv": _init_conv(ks[5], dim_out, dim_in, 1) if dim_in != dim_out else None}


def init_transformer(key, dim):
    ks = jax.random.split(key, 10)
    return {"norm_in": _init_norm(ks[0], dim),
            "cnn_in": _init_conv(ks[1], dim, dim, 1),
            "norm_atten0": _init_norm(ks[2], dim),
            "atten1": init_cross_attention(ks[3], dim, dim),
            "norm_atten1": _init_norm(ks[4], dim),
            "atten2": init_cross_attention(ks[5], dim, 768),
            "norm_act": _init_norm(ks[6], dim),
            "fc0": _init_linear(ks[7], dim * 8, dim),
            "fc1": _init_linear(ks[8], dim, dim * 4),
            "cnn_out": _init_conv(ks[9], dim, dim, 1)}


def init_downblock(key, dim_in, dim_out):
    ks = jax.random.split(key, 5)
    return {"res0": init_resnet(ks[0], dim_in, dim_out),
            "tf0": init_transformer(ks[1], dim_out),
            "res1": init_resnet(ks[2], dim_out, dim_out),
            "tf1": init_transformer(ks[3], dim_out),
            "out": _init_conv(ks[4], dim_out, dim_out, 3)}


# --------------------------------------------------------------------------
# Main
# --------------------------------------------------------------------------

if __name__ == "__main__":
    # dim_in / dim_out must be multiples of 32 (GroupNorm groups) and of 8 (heads).
    B, DIM_IN, DIM_OUT, H, W, L_ENC = 2, 32, 64, 8, 8, 8

    key = jax.random.PRNGKey(0)
    kx, ke, kt, kp = jax.random.split(key, 4)
    out_vae = jax.random.normal(kx, (B, DIM_IN, H, W), jnp.float32)       # NCHW like PyTorch
    out_encoder = jax.random.normal(ke, (B, L_ENC, 768), jnp.float32)
    time = jax.random.normal(kt, (B, 1280), jnp.float32)

    raw = init_downblock(kp, DIM_IN, DIM_OUT)
    params = prepare_downblock(raw, DIM_OUT)                              # one-time weight prep

    final, outs = downblock_forward(params, out_vae, out_encoder, time)
    jax.block_until_ready(final)
    for o in outs:
        jax.block_until_ready(o)

    assert final.shape == (B, DIM_OUT, H // 2, W // 2)
    assert outs[0].shape == (B, DIM_OUT, H, W)
    assert outs[1].shape == (B, DIM_OUT, H, W)
    assert outs[2].shape == (B, DIM_OUT, H // 2, W // 2)
    print("KERNEL_OK")
</pallas_src>

<mosaic_0001>
module attributes {stable_mosaic.version = 11 : i64} {
  func.func @_mm_kernel(%arg0: i32, %arg1: i32, %arg2: i32, %arg3: memref<2x256xf32, #tpu.memory_space<vmem>>, %arg4: memref<256x64xbf16, #tpu.memory_space<vmem>>, %arg5: memref<1x64xf32, #tpu.memory_space<vmem>>, %arg6: memref<2x64xbf16, #tpu.memory_space<vmem>>, %arg7: memref<2x64xf32, #tpu.memory_space<vmem>>) attributes {dimension_semantics = [#tpu.dimension_semantics<parallel>, #tpu.dimension_semantics<parallel>, #tpu.dimension_semantics<arbitrary>], iteration_bounds = array<i64: 1, 1, 5>, scalar_prefetch = 0 : i64, scratch_operands = 1 : i64, tpu.core_type = #tpu.core_type<tc>, window_params = [{transform_indices = @transform_0, window_bounds = array<i64: 2, 256>}, {transform_indices = @transform_1, window_bounds = array<i64: 256, 64>}, {transform_indices = @transform_2, window_bounds = array<i64: 1, 64>}, {transform_indices = @transform_3, window_bounds = array<i64: 2, 64>}]} {
    %c0_i32 = arith.constant 0 : i32
    %0 = arith.cmpi eq, %arg2, %c0_i32 : i32
    %1 = arith.extui %0 : i1 to i32
    %c0_i32_0 = arith.constant 0 : i32
    %2 = arith.cmpi ne, %1, %c0_i32_0 : i32
    scf.if %2 {
      %cst_10 = arith.constant 0.000000e+00 : f32
      %19 = vector.broadcast %cst_10 : f32 to vector<2x64xf32>
      %c0_11 = arith.constant 0 : index
      %c0_12 = arith.constant 0 : index
      %20 = vector.load %arg7[%c0_11, %c0_12] : memref<2x64xf32, #tpu.memory_space<vmem>>, vector<2x64xf32>
      tpu.vector_store %arg7[%c0_11, %c0_12], %19 {strides = array<i32>} : memref<2x64xf32, #tpu.memory_space<vmem>>, vector<2x64xf32>,
    } else {
    }
    %c0 = arith.constant 0 : index
    %c0_1 = arith.constant 0 : index
    %3 = vector.load %arg3[%c0, %c0_1] : memref<2x256xf32, #tpu.memory_space<vmem>>, vector<2x256xf32>
    %4 = arith.negf %3 : vector<2x256xf32>
    %5 = math.exp %4 : vector<2x256xf32>
    %cst = arith.constant 1.000000e+00 : f32
    %6 = vector.broadcast %cst : f32 to vector<2x256xf32>
    %7 = arith.addf %6, %5 : vector<2x256xf32>
    %8 = arith.divf %6, %7 : vector<2x256xf32>
    %9 = arith.mulf %3, %8 : vector<2x256xf32>
    %c0_2 = arith.constant 0 : index
    %c0_3 = arith.constant 0 : index
    %10 = vector.load %arg7[%c0_2, %c0_3] : memref<2x64xf32, #tpu.memory_space<vmem>>, vector<2x64xf32>
    %11 = arith.truncf %9 : vector<2x256xf32> to vector<2x256xbf16>
    %c0_4 = arith.constant 0 : index
    %c0_5 = arith.constant 0 : index
    %12 = vector.load %arg4[%c0_4, %c0_5] : memref<256x64xbf16, #tpu.memory_space<vmem>>, vector<256x64xbf16>
    %cst_6 = arith.constant dense<0.000000e+00> : vector<2x64xf32>
    %13 = tpu.matmul %11, %12, %cst_6 {dimension_numbers = #tpu.dot_dimension_numbers<[1], [0], [0], [1], [0, 0, 1, 1], [], []>} : vector<2x256xbf16>, vector<256x64xbf16>, vector<2x64xf32> -> vector<2x64xf32>
    %14 = arith.addf %10, %13 : vector<2x64xf32>
    %c0_7 = arith.constant 0 : index
    %c0_8 = arith.constant 0 : index
    %15 = vector.load %arg7[%c0_7, %c0_8] : memref<2x64xf32, #tpu.memory_space<vmem>>, vector<2x64xf32>
    tpu.vector_store %arg7[%c0_7, %c0_8], %14 {strides = array<i32>} : memref<2x64xf32, #tpu.memory_space<vmem>>, vector<2x64xf32>,
    %c4_i32 = arith.constant 4 : i32
    %16 = arith.cmpi eq, %arg2, %c4_i32 : i32
    %17 = arith.extui %16 : i1 to i32
    %c0_i32_9 = arith.constant 0 : i32
    %18 = arith.cmpi ne, %17, %c0_i32_9 : i32
    scf.if %18 {
      %c0_10 = arith.constant 0 : index
      %c0_11 = arith.constant 0 : index
      %19 = vector.load %arg7[%c0_10, %c0_11] : memref<2x64xf32, #tpu.memory_space<vmem>>, vector<2x64xf32>
      %c0_12 = arith.constant 0 : index
      %c0_13 = arith.constant 0 : index
      %20 = vector.load %arg5[%c0_12, %c0_13] : memref<1x64xf32, #tpu.memory_space<vmem>>, vector<1x64xf32>
      %21 = vector.broadcast %20 : vector<1x64xf32> to vector<2x64xf32>
      %22 = arith.addf %19, %21 : vector<2x64xf32>
      %23 = arith.truncf %22 : vector<2x64xf32> to vector<2x64xbf16>
      %c0_14 = arith.constant 0 : index
      %c0_15 = arith.constant 0 : index
      %24 = vector.load %arg6[%c0_14, %c0_15] : memref<2x64xbf16, #tpu.memory_space<vmem>>, vector<2x64xbf16>
      tpu.vector_store %arg6[%c0_14, %c0_15], %23 {strides = array<i32>} : memref<2x64xbf16, #tpu.memory_space<vmem>>, vector<2x64xbf16>,
    } else {
    }
    return
  }
  func.func @transform_0(%arg0: i32, %arg1: i32, %arg2: i32) -> (i32, i32) {
    %c0_i32 = arith.constant 0 : i32
    return %arg0, %arg2 : i32, i32
  }
  func.func @transform_1(%arg0: i32, %arg1: i32, %arg2: i32) -> (i32, i32) {
    %c0_i32 = arith.constant 0 : i32
    return %arg2, %arg1 : i32, i32
  }
  func.func @transform_2(%arg0: i32, %arg1: i32, %arg2: i32) -> (i32, i32) {
    %c0_i32 = arith.constant 0 : i32
    %c0_i32_0 = arith.constant 0 : i32
    return %c0_i32, %arg1 : i32, i32
  }
  func.func @transform_3(%arg0: i32, %arg1: i32, %arg2: i32) -> (i32, i32) {
    %c0_i32 = arith.constant 0 : i32
    return %arg0, %arg1 : i32, i32
  }
}

</mosaic_0001>

<bundles_post_ra>
// kernel: tpu_custom_call.1
= control target key start
LH: loop header
LB: loop body
LE: loop exit
PB: predicated region body
PF: predicated region fallthrough
CT: control target
= control target key end

     0   :  { %8 = vsyncpa [#allocation4], 0  ;;  %s744_s12 = smov 0   ;;  %s746_s13 = smov 0   ;;  %s833_s0 = inlined_call_operand.vmem [shape: f32[2,1280], index: 0, kind: input, shape index: {}]   ;;  %s834_s1 = inlined_call_operand.vmem [shape: bf16[1280,64], index: 1, kind: input, shape index: {}]   ;;  %s835_s2 = inlined_call_operand.vmem [shape: f32[1,64], index: 2, kind: input, shape index: {}]   ;;  %s836_s3 = inlined_call_operand.hbm [shape: bf16[2,64], index: 3, kind: output, shape index: {}]  }
   0x1   :  { %s748_s14 = smov 0  }
   0x2 LB: > { %s559_s15 = sadd.s32 4294967295, %s719_s14   ;;  %s26_s16 = sadd.s32 1, %s715_s13  ;;  %s719_s14 = sphi %s748_s14, %s14_s14   ;;  %s715_s13 = sphi %s746_s13, %s839_s13   ;;  %s711_s12 = sphi %s744_s12, %s838_s12  }
   0x3   : > { %p27_p0 = scmp.ge.s32.totalorder %s26_s16, 5  ;;  %p563_p1 = scmp.ge.s32.totalorder %s719_s14, 1 }
   0x4   : > { %p190_p2 = scmp.lt.s32.totalorder %s719_s14, 6 }
   0x5   : > { %s841_s16 = smov (%p27_p0, %s26_s16), 0 }
   0x6   : > { %p191_p3 = pnand %p563_p1, %p190_p2 }
   0x7   : > { %s564_s17 = sshll.u32 (!%p191_p3), %s711_s12, 1  ;;  %s566_s18 = sshll.u32 (!%p191_p3), %s711_s12, 5 }
   0x8   : > { %194 = sbr.rel (%p191_p3) target bundleno = 320 (0x140), region = 32  ;;  %p227_p4 = scmp.lt.s32.totalorder (!%p191_p3), %s564_s17, 9 }
   0x9   : > { %p235_p5 = scmp.lt.s32.totalorder (!%p191_p3), %s566_s18, 159  ;;  %p568_p6 = scmp.ne.s32.totalorder (!%p191_p3), %s711_s12, 0 }
   0xf   : > { %s843_s17 = smov (!%p227_p4, %s564_s17), 9  ;;  %s845_s18 = smov (!%p235_p5, %s566_s18), 159 }
  0x10   : > { %s565_s19 = sshll.u32 %s843_s17, 1  ;;  %s567_s23 = sshll.u32 %s845_s18, 2  ;;  %vm251_vm0 = vcmask (!%p568_p6), 517120   ;;  %v721_v0 = vmov (!%p568_p6), 0.0  }
  0x11   : > { %s232_s22 = scalar_lea.vmem %s833_s0, %s565_s19  ;;  %s773_s26 = scalar_lea.vmem %s834_s1, %s567_s23  ;;  %252 = vst.msk [vmem:[#allocation2] sm:$0x3] (!%p568_p6), %vm251_vm0, %v721_v0 }
  0x12   : > { %250 = sbr.rel (%p568_p6) target bundleno = 25 (0x19), region = 36 }
  0x19 PF: > { %v647_v1 = vld [vmem:[%s773_s26 + $0x40] sm:$0xff]   ;;  %v649_v3 = vld [vmem:[%s773_s26 + $0x48] sm:$0xff]   ;;  %v651_v5 = vld [vmem:[%s773_s26 + $0x50] sm:$0xff]   ;;  %v722_v21 = vmov 1983009808   ;;  %v266_v23 = vlaneseq  ;;  %vm444_vm1 = vcmask 517120  }
  0x1a   : > { %v648_v2 = vld [vmem:[%s773_s26] sm:$0xff]   ;;  %592 = vmatprep.subr.bf16.mxu0 %v647_v1  ;;  %v650_v4 = vld [vmem:[%s773_s26 + $0x8] sm:$0xff]   ;;  %v652_v6 = vld [vmem:[%s773_s26 + $0x10] sm:$0xff]   ;;  %v264_v22 = vunpack.c.l.s4 %v722_v21  ;;  %p586_p7 = scmp.ne.s32.totalorder %s711_s12, 4 }
  0x1b   : > { %593 = vmatpush3.bf16.msra.mxu0 %v648_v2  ;;  %v653_v7 = vld [vmem:[%s773_s26 + $0x58] sm:$0xff]   ;;  %v655_v9 = vld [vmem:[%s773_s26 + $0x60] sm:$0xff]   ;;  %v657_v11 = vld [vmem:[%s773_s26 + $0x68] sm:$0xff]   ;;  %v267_v25 = vshrl.u32 %v266_v23, 7  ;;  %vm460_vm2 = vcmask (!%p586_p7), 516096  }
  0x1c   : > { %594 = vmatprep.subr.bf16.mxu0 %v649_v3  ;;  %v654_v8 = vld [vmem:[%s773_s26 + $0x18] sm:$0xff]   ;;  %v656_v10 = vld [vmem:[%s773_s26 + $0x20] sm:$0xff]   ;;  %v658_v14 = vld [vmem:[%s773_s26 + $0x28] sm:$0xff]   ;;  %v265_v24 = vunpack.c.0.s8 %v264_v22 }
  0x1d   : > { %v253_v12 = vld [vmem:[%s232_s22] sm:$0xf]  ;;  %v659_v15 = vld [vmem:[%s773_s26 + $0x70] sm:$0xff]   ;;  %v661_v17 = vld [vmem:[%s773_s26 + $0x78] sm:$0xff]  }
  0x1e   : > { %v569_v13 = vmul.f32 -1.442695, %v253_v12  ;;  %v660_v16 = vld [vmem:[%s773_s26 + $0x30] sm:$0xff]   ;;  %v662_v18 = vld [vmem:[%s773_s26 + $0x38] sm:$0xff]   ;;  %v268_v26 = vsub.s32 %v265_v24, %v267_v25  ;;  %v261_v34 = vld [vmem:[#allocation2] sm:$0x3] }
  0x1f   : > { %595 = vmatpush3.bf16.msra.mxu0 %v650_v4  ;;  %v587_v41 = vld [vmem:[%s835_s2] ss:$0 sm:$0xff] (!%p586_p7) }
  0x20   : > { %596 = vmatprep.subr.bf16.mxu0 %v651_v5  ;;  %663 = vpow2.f32 %v569_v13 }
  0x23   : > { %597 = vmatpush3.bf16.msra.mxu0 %v652_v6 }
  0x24   : > { %598 = vmatprep.subr.bf16.mxu0 %v653_v7 }
  0x27   : > { %599 = vmatpush3.bf16.msra.mxu0 %v654_v8 }
  0x28   : > { %600 = vmatprep.subr.bf16.mxu0 %v655_v9 }
  0x2a   : > { %v664_v19 = vpop.eup %663 }
  0x2b   : > { %601 = vmatpush3.bf16.msra.mxu0 %v656_v10  ;;  %v257_v20 = vadd.f32 1.0, %v664_v19 }
  0x2c   : > { %602 = vmatprep.subr.bf16.mxu0 %v657_v11 }
  0x2d   : > { %665 = vrcp.f32 %v257_v20 }
  0x2f   : > { %603 = vmatpush3.bf16.msra.mxu0 %v658_v14 }
  0x30   : > { %604 = vmatprep.subr.bf16.mxu0 %v659_v15 }
  0x33   : > { %605 = vmatpush3.bf16.msra.mxu0 %v660_v16 }
  0x34   : > { %606 = vmatprep.subr.bf16.mxu0 %v661_v17 }
  0x37   : > { %607 = vmatpush3.bf16.msra.mxu0 %v662_v18  ;;  %v666_v27 = vpop.eup %665 }
  0x38   : > { %v260_v28 = vmul.f32 %v666_v27, %v253_v12 }
  0x3a   : > { %v269_v29 = vrot.slane %v260_v28, %v268_v26 }
  0x3c   : > { %v270_v30 = vcombine.high %v269_v29, %v269_v29  ;;  %v273_v31 = vpack.c.bf16 %v269_v29, %v269_v29 }
  0x3e   : > { %v274_v32 = vpack.c.bf16 %v270_v30, %v270_v30 }
  0x40   : > { %435 = vmatprep.mubr.bf16.mxu0 %v274_v32 }
  0x41   : > { %436 = vmatmul.mubr.bf16.vlgmr.msra.gmra.mrb[0].mxu0 %v273_v31 }
 0x114   : > { %v608_v33 = vpop.f32.mrb[0].mxu0  ;;  %449 = sbr.rel (%p586_p7) target bundleno = 295 (0x127), region = 40 }
 0x115   : > { %v609_v35 = vpop.f32.mrb[1].mxu0 }
 0x116   : > { %v610_v36 = vadd.f32 %v609_v35, %v608_v33  ;;  %v611_v37 = vpop.f32.mrb[2].mxu0 }
 0x117   : > { %v612_v38 = vpop.f32.mrb[3].mxu0 }
 0x118   : > { %v443_v39 = vadd.f32 %v610_v36, %v261_v34 }
 0x11a   : > { %445 = vst.msk [vmem:[#allocation2] sm:$0x3] %vm444_vm1, %v443_v39 }
 0x121   : > { %v450_v40 = vld [vmem:[#allocation2] sm:$0x3] }
 0x122   : > { %v458_v42 = vadd.f32 %v587_v41, %v450_v40 }
 0x124   : > { %v459_v43 = vpack.c.bf16 %v458_v42, %v458_v42 }
 0x126   : > { %461 = vst.msk [vmem:[#allocation3] sm:$0x1] %vm460_vm2, %v459_v43 }
 0x127 PF: > { %p798_p8 = scmp.eq.s32.totalorder %s559_s15, 4  ;;  %s723_s30 = smov [#allocation3]  }
 0x128   : > { %s472_s4 = sshll.u32 %s723_s30, 4  ;;  %s473_s4 = int_to_ptr.vmem [resolvable:$true] %s472_s4 }
 0x129   : > { %s667_s5 = scalar_lea.vmem %s473_s4, 16  ;;  %s673_s6 = scalar_lea.vmem %s473_s4, 32 }
 0x12a   : > { %p668_p9 = scmp.ne.s32.totalorder %s473_s4, %s667_s5  ;;  %p674_p12 = scmp.lt.s32.totalorder %s473_s4, %s473_s4 }
 0x12b   : > { %p675_p13 = scmp.lt.s32.totalorder %s673_s6, %s667_s5 }
 0x12c   : > { %p669_p10 = pnand %p668_p9, %p798_p8 }
 0x12d   : > { %p676_p0 = por %p675_p13, %p674_p12 }
 0x12e   : > { %p670_p11 = pneg %p669_p10 }
 0x130   : > { %p677_p1 = pnand %p676_p0, %p670_p11 }
 0x132   : > { %680 = shalt.err (!%p677_p1)
}
 0x133   : > { %s681_s9 = scalar_lea.hbm %s836_s3, 16 }
 0x134   : > { %p682_p2 = scmp.ne.s32.totalorder %s836_s3, %s681_s9  ;;  %p687_p5 = scmp.lt.u32.totalorder %s681_s9, %s836_s3 }
 0x136   : > { %p683_p3 = pnand %p682_p2, %p798_p8 }
 0x138   : > { %p684_p4 = pneg %p683_p3 }
 0x13a   : > { %p689_p6 = pnand %p687_p5, %p684_p4 }
 0x13c   : > { %692 = shalt.err (!%p689_p6)
}
 0x13d   : > { %615 = dma.vmem_to_hbm [thread:$0]  (%p798_p8), %s473_s4, 16, %s836_s3, [#allocation4]  }
 0x13e   : > { %706 = dma.done.wait (%p798_p8), [#allocation4], 16  }
 0x13f   : > { %708 = vsyncadd (%p798_p8), [#allocation4], 4294967280 }
 0x140 PF: > { %s14_s14 = sadd.s32 1, %s719_s14   ;;  %s838_s12 = smov %s715_s13 }
 0x141   : > { %p11_p7 = scmp.ge.s32.totalorder %s14_s14, 7   ;;  %s839_s13 = smov %s841_s16 }
 0x143   :  { %13 = sbr.rel (!%p11_p7) target bundleno = 2 (0x2), region = 74 }
 0x14a   :  { %485 = vsyncpa [#allocation4], 1 }
 0x14b   :  { %487 = vsyncpa [#allocation4 + $0x1], 1 }

</bundles_post_ra>
